<compile_context>
chip_gen: v6e
topology: v6e:2x2x1
jax: 0.10.0
libtpu: 0.0.40
codegen_flags: <defaults>
</compile_context>

<pallas_src>
import math

import jax
import jax.numpy as jnp
from jax.experimental import pallas as pl
from jax.experimental.pallas import tpu as pltpu

_LANE = 128
_VMEM_BUDGET = 40 * 1024 * 1024        # per-call tile footprint cap (v7x: 64 MiB/TC)
_VMEM_LIMIT = 48 * 1024 * 1024         # scoped-VMEM limit handed to Mosaic
_B_RESIDENT_MAX_BYTES = 8 * 1024 * 1024  # B kept VMEM-resident below this (2x buffered)


def _round_up(v, m):
    return (v + m - 1) // m * m


def _pad2d(a, rows, cols):
    r, c = a.shape
    if r == rows and c == cols:
        return a
    return jnp.pad(a, ((0, rows - r), (0, cols - c)))


def _make_mm_bias_kernel(tk, n_k, resident_b):
    """Kernel for O = A @ B + bias, tiled over (row_tile, k_tile)."""

    if n_k == 1:
        # Single reduction step: no accumulator init/copy round-trip needed.
        def kernel(a_ref, b_ref, bias_ref, o_ref):
            a = a_ref[...]
            b = b_ref[...]
            if a.dtype != b.dtype:
                a = a.astype(b.dtype)      # in-kernel cast; VPU work under the MXU
            o_ref[...] = (
                jnp.dot(a, b, preferred_element_type=jnp.float32) + bias_ref[...]
            ).astype(o_ref.dtype)

        return kernel

    def kernel(a_ref, b_ref, bias_ref, o_ref, acc_ref):
        kk = pl.program_id(1)

        @pl.when(kk == 0)
        def _():
            acc_ref[...] = jnp.zeros_like(acc_ref)

        a = a_ref[...]
        if resident_b:
            # B is fully resident in VMEM (loaded once): slice the k-slab here.
            start = pl.multiple_of(kk * tk, _LANE)
            b = b_ref[pl.ds(start, tk), :]
        else:
            b = b_ref[...]
        if a.dtype != b.dtype:
            a = a.astype(b.dtype)
        acc_ref[...] += jnp.dot(a, b, preferred_element_type=jnp.float32)

        @pl.when(kk == pl.num_programs(1) - 1)
        def _():
            # Bias folded into the finalize branch only (off the per-k path).
            o_ref[...] = (acc_ref[...] + bias_ref[...]).astype(o_ref.dtype)

    return kernel


def _matmul_bias(a, b, bias_row, *, tm, tk, out_dtype,
                 b_resident_max_bytes=_B_RESIDENT_MAX_BYTES):
    """Tiled, pipelined  A[m,k] @ B[k,n] + bias[1,n]  ->  [m,n] (out_dtype)."""
    m, k = a.shape
    k2, n = b.shape
    assert k == k2 and m % tm == 0 and k % tk == 0
    out_isz = jnp.dtype(out_dtype).itemsize

    # Keep B fully resident in VMEM when it fits (avoids re-streaming it once
    # per row tile). Budget includes the default double-buffering.
    b_resident = (2 * k * n * b.dtype.itemsize) <= b_resident_max_bytes

    def _footprint(tk_):
        a_bytes = 2 * tm * tk_ * a.dtype.itemsize
        b_bytes = 2 * (k if b_resident else tk_) * n * b.dtype.itemsize
        acc_bytes = tm * n * 4
        out_bytes = 2 * tm * n * out_isz
        return a_bytes + b_bytes + acc_bytes + out_bytes

    # Shrink the reduction tile if the footprint would blow the v7x VMEM budget.
    while tk > _LANE and _footprint(tk) > _VMEM_BUDGET and k % (tk // 2) == 0:
        tk //= 2
    # TODO(synk): for very wide outputs (f_out_pad >= ~2048) add an output-column
    # grid axis instead of shrinking tk so the accumulator stays VMEM-bounded.

    n_k = k // tk
    grid = (m // tm, n_k)
    kernel = _make_mm_bias_kernel(tk, n_k, b_resident)

    if b_resident or n_k == 1:
        b_spec = pl.BlockSpec((k, n), lambda i, kk: (0, 0))      # resident, loaded once
    else:
        b_spec = pl.BlockSpec((tk, n), lambda i, kk: (kk, 0))    # streamed k-slab

    scratch = [] if n_k == 1 else [pltpu.VMEM((tm, n), jnp.float32)]

    a_stream = m * k * a.dtype.itemsize
    b_stream = (1 if (b_resident or n_k == 1) else (m // tm)) * k * n * b.dtype.itemsize
    bytes_accessed = (a_stream + b_stream
                      + bias_row.size * bias_row.dtype.itemsize
                      + m * n * out_isz)

    return pl.pallas_call(
        kernel,
        out_shape=jax.ShapeDtypeStruct((m, n), out_dtype),
        grid_spec=pltpu.PrefetchScalarGridSpec(
            num_scalar_prefetch=0,
            grid=grid,
            in_specs=[
                pl.BlockSpec((tm, tk), lambda i, kk: (i, kk)),   # A tile (streamed)
                b_spec,                                          # B (resident or slab)
                pl.BlockSpec((1, n), lambda i, kk: (0, 0)),      # bias row
            ],
            out_specs=pl.BlockSpec((tm, n), lambda i, kk: (i, 0)),
            scratch_shapes=scratch,
        ),
        compiler_params=pltpu.CompilerParams(
            # Row tiles shard across TCs (v7x megacore); reduction axis last.
            dimension_semantics=("parallel", "arbitrary"),
            vmem_limit_bytes=_VMEM_LIMIT,
        ),
        cost_estimate=pl.CostEstimate(
            flops=2 * m * k * n, transcendentals=0, bytes_accessed=bytes_accessed),
    )(a, b, bias_row)


def _choose_adj_tiles(n):
    """(n_pad, row_tile, k_tile) for the adj matmul."""
    if n <= 2048:
        # Small/medium graph: pad to a multiple of 256 so there are always >=2
        # row tiles (v7x 2-TC sharding) and do the whole reduction in a single
        # k step (no per-step pipeline overhead on the reduction axis).
        n_pad = max(_round_up(n, 256), 256)
        return n_pad, n_pad // 2, n_pad
    # Large graph: 512-row tiles, reduction tile as large as divides n_pad.
    n_pad = _round_up(n, 512)
    for cand in (2048, 1024, 512):
        if n_pad % cand == 0:
            return n_pad, 512, cand
    return n_pad, 512, 512  # unreachable (n_pad is a multiple of 512)


def graph_convolution(x, adj, weight, bias=None, *, compute_dtype=jnp.bfloat16,
                      adj_row_tile=None, adj_k_tile=None):
    """Fused GCN layer forward: adj @ (x @ weight) + bias (f32 output).

    Matmul operands use `compute_dtype` (default bf16, f32 accumulation via
    preferred_element_type), halving the dominant adj HBM stream. Pass
    compute_dtype=jnp.float32 for full-precision operands.
    """
    n, f_in = x.shape
    f_out = weight.shape[1]

    if adj_row_tile is not None or adj_k_tile is not None:
        tm = adj_row_tile or 256
        tk = adj_k_tile or tm
        n_pad = _round_up(n, math.lcm(tm, tk))
    else:
        n_pad, tm, tk = _choose_adj_tiles(n)

    f_in_pad = _round_up(f_in, _LANE)
    f_out_pad = _round_up(f_out, _LANE)

    xd = _pad2d(x, n_pad, f_in_pad).astype(compute_dtype)
    wd = _pad2d(weight, f_in_pad, f_out_pad).astype(compute_dtype)

    # adj is the dominant HBM stream. If it is already tile-aligned, stream it
    # as-is (no extra cast/pad pass over N^2 elements); tiles are cast to the
    # compute dtype inside the kernel. Otherwise fuse the cast into the single
    # unavoidable padding pass.
    if adj.shape == (n_pad, n_pad):
        adjd = adj
    else:
        adjd = _pad2d(adj.astype(compute_dtype), n_pad, n_pad)

    if bias is None:
        bias_row = jnp.zeros((1, f_out_pad), jnp.float32)
    else:
        bias_row = _pad2d(bias.reshape(1, f_out).astype(jnp.float32), 1, f_out_pad)
    zero_bias_in = jnp.zeros((1, f_in_pad), jnp.float32)
    zero_bias_out = jnp.zeros((1, f_out_pad), jnp.float32)

    if f_out <= f_in:
        # support = X @ W once (single-k-step, no accumulator), then the big
        # adj matmul with support held resident in VMEM when it fits.
        support = _matmul_bias(xd, wd, zero_bias_out,
                               tm=tm, tk=f_in_pad, out_dtype=compute_dtype)
        out = _matmul_bias(adjd, support, bias_row,
                           tm=tm, tk=tk, out_dtype=jnp.float32)
    else:
        # (adj @ X) @ W: cheaper flops and a smaller operand streamed against
        # each adj tile when F_in < F_out.
        tmp = _matmul_bias(adjd, xd, zero_bias_in,
                           tm=tm, tk=tk, out_dtype=compute_dtype)
        out = _matmul_bias(tmp, wd, bias_row,
                           tm=tm, tk=f_in_pad, out_dtype=jnp.float32)

    return out[:n, :f_out]


if __name__ == "__main__":
    def reference(x, adj, w, b):
        hp = jax.lax.Precision.HIGHEST
        out = jnp.dot(adj, jnp.dot(x, w, precision=hp), precision=hp)
        return out + b if b is not None else out

    def make_case(key, n, f_in, f_out):
        k_x, k_adj, k_w, k_b = jax.random.split(key, 4)
        # Matches reset_parameters(): uniform(-stdv, stdv), stdv = 1/sqrt(f_out)
        stdv = 1.0 / math.sqrt(f_out)
        w = jax.random.uniform(k_w, (f_in, f_out), jnp.float32, -stdv, stdv)
        b = jax.random.uniform(k_b, (f_out,), jnp.float32, -stdv, stdv)
        x = jax.random.normal(k_x, (n, f_in), jnp.float32)
        adj_raw = jax.random.uniform(k_adj, (n, n), jnp.float32)
        adj = adj_raw / jnp.sum(adj_raw, axis=1, keepdims=True)
        return x, adj, w, b

    keys = jax.random.split(jax.random.PRNGKey(0), 4)

    # 1) Small graph (padding path), f_out > f_in -> (adj @ X) @ W ordering.
    x, adj, w, b = make_case(keys[0], 16, 32, 64)
    ref = reference(x, adj, w, b)
    out = jax.block_until_ready(graph_convolution(x, adj, w, b))
    assert out.shape == (16, 64)
    assert jnp.allclose(out, ref, atol=5e-2, rtol=5e-2)             # bf16 operands
    out = jax.block_until_ready(
        graph_convolution(x, adj, w, b, compute_dtype=jnp.float32))
    assert jnp.allclose(out, ref, atol=2e-4, rtol=2e-3)             # f32 operands

    # 2) Tile-aligned graph (adj streamed unpadded, in-kernel cast), f_out <= f_in
    #    -> adj @ (X @ W) ordering; also exercises bias=None.
    x, adj, w, b = make_case(keys[1], 256, 64, 32)
    ref = reference(x, adj, w, b)
    out = jax.block_until_ready(graph_convolution(x, adj, w, b))
    assert out.shape == (256, 32)
    assert jnp.allclose(out, ref, atol=5e-2, rtol=5e-2)
    ref_nb = reference(x, adj, w, None)
    out_nb = jax.block_until_ready(
        graph_convolution(x, adj, w, None, compute_dtype=jnp.float32))
    assert jnp.allclose(out_nb, ref_nb, atol=2e-4, rtol=2e-3)

    # 3) Multi-k-step accumulator path with VMEM-resident B (tile override), f32.
    x, adj, w, b = make_case(keys[2], 512, 32, 32)
    ref = reference(x, adj, w, b)
    out = jax.block_until_ready(
        graph_convolution(x, adj, w, b, compute_dtype=jnp.float32,
                          adj_row_tile=128, adj_k_tile=128))
    assert out.shape == (512, 32)
    assert jnp.allclose(out, ref, atol=2e-4, rtol=2e-3)

    # 4) Multi-k-step streamed-B fallback path, exercised directly.
    k_a, k_b2 = jax.random.split(keys[3])
    A = jax.random.normal(k_a, (256, 512), jnp.float32)
    B = jax.random.normal(k_b2, (512, 128), jnp.float32)
    bias0 = jnp.zeros((1, 128), jnp.float32)
    out = jax.block_until_ready(
        _matmul_bias(A, B, bias0, tm=128, tk=128, out_dtype=jnp.float32,
                     b_resident_max_bytes=0))
    ref_mm = jnp.dot(A, B, precision=jax.lax.Precision.HIGHEST)
    assert jnp.allclose(out, ref_mm, atol=5e-3, rtol=5e-3)

    print("KERNEL_OK")
</pallas_src>

<mosaic_0001>
module attributes {stable_mosaic.version = 11 : i64} {
  func.func @kernel(%arg0: i32, %arg1: i32, %arg2: memref<128x256xbf16, #tpu.memory_space<vmem>>, %arg3: memref<256x128xbf16, #tpu.memory_space<vmem>>, %arg4: memref<1x128xf32, #tpu.memory_space<vmem>>, %arg5: memref<128x128xbf16, #tpu.memory_space<vmem>>) attributes {dimension_semantics = [#tpu.dimension_semantics<parallel>, #tpu.dimension_semantics<arbitrary>], iteration_bounds = array<i64: 2, 1>, scalar_prefetch = 0 : i64, scratch_operands = 0 : i64, tpu.core_type = #tpu.core_type<tc>, window_params = [{transform_indices = @transform_0, window_bounds = array<i64: 128, 256>}, {pipeline_mode = #tpu.pipeline_mode<synchronous>, transform_indices = @transform_1, window_bounds = array<i64: 256, 128>}, {pipeline_mode = #tpu.pipeline_mode<synchronous>, transform_indices = @transform_2, window_bounds = array<i64: 1, 128>}, {transform_indices = @transform_3, window_bounds = array<i64: 128, 128>}]} {
    %c0 = arith.constant 0 : index
    %c0_0 = arith.constant 0 : index
    %0 = vector.load %arg2[%c0, %c0_0] : memref<128x256xbf16, #tpu.memory_space<vmem>>, vector<128x256xbf16>
    %c0_1 = arith.constant 0 : index
    %c0_2 = arith.constant 0 : index
    %1 = vector.load %arg3[%c0_1, %c0_2] : memref<256x128xbf16, #tpu.memory_space<vmem>>, vector<256x128xbf16>
    %cst = arith.constant dense<0.000000e+00> : vector<128x128xf32>
    %2 = tpu.matmul %0, %1, %cst {dimension_numbers = #tpu.dot_dimension_numbers<[1], [0], [0], [1], [0, 0, 1, 1], [], []>} : vector<128x256xbf16>, vector<256x128xbf16>, vector<128x128xf32> -> vector<128x128xf32>
    %c0_3 = arith.constant 0 : index
    %c0_4 = arith.constant 0 : index
    %3 = vector.load %arg4[%c0_3, %c0_4] : memref<1x128xf32, #tpu.memory_space<vmem>>, vector<1x128xf32>
    %4 = vector.broadcast %3 : vector<1x128xf32> to vector<128x128xf32>
    %5 = arith.addf %2, %4 : vector<128x128xf32>
    %6 = arith.truncf %5 : vector<128x128xf32> to vector<128x128xbf16>
    %c0_5 = arith.constant 0 : index
    %c0_6 = arith.constant 0 : index
    %7 = vector.load %arg5[%c0_5, %c0_6] : memref<128x128xbf16, #tpu.memory_space<vmem>>, vector<128x128xbf16>
    tpu.vector_store %arg5[%c0_5, %c0_6], %6 {strides = array<i32>} : memref<128x128xbf16, #tpu.memory_space<vmem>>, vector<128x128xbf16>,
    return
  }
  func.func @transform_0(%arg0: i32, %arg1: i32) -> (i32, i32) {
    %c0_i32 = arith.constant 0 : i32
    return %arg0, %arg1 : i32, i32
  }
  func.func @transform_1(%arg0: i32, %arg1: i32) -> (i32, i32) {
    %c0_i32 = arith.constant 0 : i32
    %c0_i32_0 = arith.constant 0 : i32
    %c0_i32_1 = arith.constant 0 : i32
    return %c0_i32, %c0_i32_0 : i32, i32
  }
  func.func @transform_2(%arg0: i32, %arg1: i32) -> (i32, i32) {
    %c0_i32 = arith.constant 0 : i32
    %c0_i32_0 = arith.constant 0 : i32
    %c0_i32_1 = arith.constant 0 : i32
    return %c0_i32, %c0_i32_0 : i32, i32
  }
  func.func @transform_3(%arg0: i32, %arg1: i32) -> (i32, i32) {
    %c0_i32 = arith.constant 0 : i32
    %c0_i32_0 = arith.constant 0 : i32
    return %arg0, %c0_i32 : i32, i32
  }
}

</mosaic_0001>

<bundles_post_ra>
// kernel: tpu_custom_call.1
= control target key start
LH: loop header
LB: loop body
LE: loop exit
PB: predicated region body
PF: predicated region fallthrough
CT: control target
= control target key end

     0   :  { %8 = vsyncpa [#allocation3], 0  ;;  %s1471_s0 = inlined_call_operand.hbm [shape: bf16[256,256], index: 0, kind: input, shape index: {}]   ;;  %s1472_s1 = inlined_call_operand.hbm [shape: bf16[256,128], index: 1, kind: input, shape index: {}]   ;;  %s1473_s2 = inlined_call_operand.vmem [shape: f32[1,128], index: 2, kind: input, shape index: {}]   ;;  %s1474_s3 = inlined_call_operand.hbm [shape: bf16[256,128], index: 3, kind: output, shape index: {}]  }
   0x1   :  { %10 = vsyncpa [#allocation3 + $0x1], 0 }
   0x2   :  { %11 = vsyncpa [#allocation6], 0 }
   0x3   :  { %12 = vsyncpa [#allocation4], 0 }
   0x4   :  { %14 = vsyncpa [#allocation4 + $0x1], 0  ;;  %s1239_s12 = smov 0   ;;  %s1241_s13 = smov 0  }
   0x5   :  { %s1243_s14 = smov 0   ;;  %s1245_s15 = smov 0  }
   0x6   :  { %s1247_s16 = smov 0   ;;  %s1249_s17 = smov 0  }
   0x7 LB: > { %s738_s18 = sadd.s32 4294967295, %s1208_s17   ;;  %s739_s19 = sadd.s32 4294967294, %s1208_s17   ;;  %s1208_s17 = sphi %s1249_s17, %s20_s17   ;;  %s1204_s16 = sphi %s1247_s16, %s1492_s16   ;;  %s1200_s15 = sphi %s1245_s15, %s1491_s15   ;;  %s1196_s14 = sphi %s1243_s14, %s1490_s14   ;;  %s1192_s13 = sphi %s1241_s13, %s1489_s13   ;;  %s1188_s12 = sphi %s1239_s12, %s1488_s12  }
   0x8   : > { %p54_p0 = scmp.ne.s32.totalorder %s1192_s13, %s1188_s12  ;;  %p1273_p1 = scmp.eq.s32.totalorder %s738_s18, 0 }
   0x9   : > { %p1277_p2 = scmp.eq.s32.totalorder %s738_s18, 1  ;;  %p126_p3 = scmp.eq.s32.totalorder %s739_s19, 1 }
   0xa   : > { %p1283_p4 = por %p1273_p1, %p54_p0  ;;  %p740_p5 = scmp.ge.s32.totalorder %s1208_s17, 1 }
   0xb   : > { %p1288_p6 = por %p126_p3, %p54_p0  ;;  %p133_p7 = scmp.lt.s32.totalorder %s1208_s17, 3 }
   0xc   : > { %s1478_s22 = scalar_select %p1283_p4, 1, 0 }
   0xd   : > { %s1479_s23 = scalar_select %p1288_p6, 1, 0 }
   0xe   : > { %p1293_p8 = pnand %p740_p5, %p133_p7  ;;  %s1210_s25 = smov [#allocation5]  }
   0xf   : > { %s145_s26 = sshll.u32 %s1210_s25, 4  ;;  %s32_s28 = sadd.s32 1, %s1204_s16  ;;  %s146_s26 = int_to_ptr.vmem [resolvable:$true] %s145_s26 }
  0x10   : > { %p959_p9 = pneg %p1293_p8  ;;  %s1081_s29 = scalar_lea.vmem %s146_s26, 2048 }
  0x11   : > { %p1082_p13 = scmp.ne.s32.totalorder %s146_s26, %s1081_s29  ;;  %p1089_p5 = scmp.lt.s32.totalorder %s146_s26, %s146_s26 }
  0x12   : > { %p1302_p11 = pnand %p959_p9, %p1273_p1  ;;  %p1090_p7 = scmp.lt.s32.totalorder %s1081_s29, %s1081_s29 }
  0x14   : > { %p1072_p12 = pneg %p1302_p11  ;;  %p1091_p6 = por %p1090_p7, %p1089_p5 }
  0x16   : > { %p1084_p0 = pnand %p1082_p13, %p1072_p12 }
  0x18   : > { %p1085_p3 = pneg %p1084_p0 }
  0x1a   : > { %p1092_p4 = pnand %p1091_p6, %p1085_p3 }
  0x1c   : > { %1095 = shalt.err (!%p1092_p4)
}
  0x1d   : > { %s1211_s30 = smov 64   ;;  %s1212_s4 = smov 4  }
  0x1e   : > { %962 = dma.hbm_to_vmem [thread:$0]  (!%p1302_p11), %s1472_s1, 2048, %s146_s26, [#allocation6], %s1211_s30, %s1211_s30, %s1212_s4  }
  0x1f   : > { %p34_p6 = scmp.ge.s32.totalorder %s32_s28, 2  ;;  %s41_s7 = sadd.s32 1, %s1196_s14 }
  0x20   : > { %p48_p4 = scmp.ne.s32.totalorder %s1196_s14, %s1192_s13  ;;  %p49_p9 = scmp.eq.s32.totalorder %s1208_s17, 0 }
  0x21   : > { %s1494_s28 = smov (%p34_p6, %s32_s28), 0  ;;  %p972_p0 = scmp.lt.s32.totalorder %s1208_s17, 2 }
  0x22   : > { %p1320_p12 = por %p49_p9, %p48_p4  ;;  %p1326_p13 = por %p1277_p2, %p48_p4 }
  0x23   : > { %s36_s10 = ssub.s32 %s1204_s16, %s1494_s28  ;;  %s162_s11 = sand.u32 1, %s1196_s14  }
  0x24   : > { %p39_p11 = scmp.eq.s32.totalorder %s36_s10, 0  ;;  %s743_s18 = sshll.u32 %s162_s11, 7 }
  0x25   : > { %s806_s25 = sshll.u32 %s1204_s16, 11  ;;  %s166_s30 = scalar_lea.vmem [#allocation2], %s743_s18 }
  0x26   : > { %s1335_s19 = scalar_select %p39_p11, %s1196_s14, %s41_s7  }
  0x27   : > { %s175_s29 = scalar_lea.hbm %s1471_s0, %s806_s25  ;;  %s176_s4 = sshll.u32 %s166_s30, 4  ;;  %s177_s4 = int_to_ptr.vmem [resolvable:$true] %s176_s4 }
  0x28   : > { %p1343_p2 = pnand %p972_p0, %p1320_p12  ;;  %s163_s5 = scalar_lea.sflag [#allocation3], %s162_s11 }
  0x29   : > { %s1109_s6 = scalar_lea.vmem %s177_s4, 2048  ;;  %s1213_s7 = smov [#allocation2]  }
  0x2a   : > { %p1098_p3 = pneg %p1343_p2  ;;  %p1110_p5 = scmp.ne.s32.totalorder %s177_s4, %s1109_s6 }
  0x2b   : > { %s1114_s10 = sshll.u32 %s1213_s7, 4  ;;  %s1115_s10 = int_to_ptr.vmem [resolvable:$false] %s1114_s10 }
  0x2c   : > { %p1112_p7 = pnand %p1110_p5, %p1098_p3  ;;  %s1116_s25 = scalar_lea.vmem %s1115_s10, 4096 }
  0x2d   : > { %p1117_p4 = scmp.lt.s32.totalorder %s177_s4, %s1115_s10  ;;  %p1118_p9 = scmp.lt.s32.totalorder %s1116_s25, %s1109_s6 }
  0x2e   : > { %p1113_p6 = pneg %p1112_p7 }
  0x2f   : > { %p1119_p11 = por %p1118_p9, %p1117_p4 }
  0x31   : > { %p1120_p10 = pnand %p1119_p11, %p1113_p6 }
  0x33   : > { %1123 = shalt.err (!%p1120_p10)
}
  0x34   : > { %s1214_s8 = smov 128   ;;  %s1215_s18 = smov 8  }
  0x35   : > { %966 = dma.hbm_to_vmem [thread:$0]  (!%p1343_p2), %s175_s29, 2048, %s177_s4, %s163_s5, %s1214_s8, %s1214_s8, %s1215_s18  }
  0x36   : > { %188 = sbr.rel (%p1293_p8) target bundleno = 338 (0x152), region = 32  ;;  %s1354_s11 = sand.u32 (!%p1293_p8), 1, %s1192_s13  }
  0x37   : > { %s748_s26 = sshll.u32 (!%p1293_p8), %s1354_s11, 7  ;;  %s191_s27 = scalar_lea.sflag (!%p1293_p8), [#allocation3], %s1354_s11 }
  0x38   : > { %s1358_s30 = scalar_lea.vmem (!%p1293_p8), [#allocation2], %s748_s26  ;;  %p1485_p12 = scmp.ne.s32.totalorder (!%p1293_p8), %s1478_s22, 0 }
  0x3b   : > { %1175 = dma.done.wait (%p1485_p12), %s191_s27, 2048  }
  0x3c   : > { %1177 = vsyncadd (%p1485_p12), %s191_s27, 4294965248 }
  0x3d   : > { %1179 = dma.done.wait (%p1273_p1), [#allocation6], 2048  }
  0x3e   : > { %1181 = vsyncadd (%p1273_p1), [#allocation6], 4294965248  ;;  %v1030_v0 = vld [vmem:[#allocation5 + $0x78] sm:$0xff]   ;;  %v1032_v2 = vld [vmem:[#allocation5 + $0x70] sm:$0xff]   ;;  %s750_s24 = sshll.u32 %s1354_s11, 6  ;;  %s823_s4 = sshll.u32 %s1200_s15, 10 }
  0x3f   : > { %v1031_v1 = vld [vmem:[#allocation5 + $0x38] sm:$0xff]   ;;  %871 = vmatprep.subr.bf16.mxu0 %v1030_v0  ;;  %935 = vmatprep.subr.bf16.mxu1 %v1030_v0  ;;  %v1033_v3 = vld [vmem:[#allocation5 + $0x30] sm:$0xff]   ;;  %v1034_v4 = vld [vmem:[#allocation5 + $0x68] sm:$0xff]   ;;  %s1394_s29 = scalar_lea.vmem [#allocation7], %s750_s24  ;;  %s1419_s7 = scalar_lea.hbm %s1474_s3, %s823_s4 }
  0x40   : > { %872 = vmatpush3.bf16.msra.mxu0 %v1031_v1  ;;  %943 = vmatpush3.bf16.msra.mxu1 %v1031_v1  ;;  %v1035_v5 = vld [vmem:[#allocation5 + $0x28] sm:$0xff]   ;;  %v1036_v6 = vld [vmem:[#allocation5 + $0x60] sm:$0xff]   ;;  %v1038_v8 = vld [vmem:[#allocation5 + $0x58] sm:$0xff]   ;;  %s647_s21 = sshll.u32 %s1394_s29, 4  ;;  %s634_s15 = scalar_lea.sflag [#allocation4], %s1354_s11  ;;  %s1421_s21 = int_to_ptr.vmem [resolvable:$true] %s647_s21 }
  0x41   : > { %873 = vmatprep.subr.bf16.mxu0 %v1032_v2  ;;  %936 = vmatprep.subr.bf16.mxu1 %v1032_v2  ;;  %v1037_v7 = vld [vmem:[#allocation5 + $0x20] sm:$0xff]   ;;  %v1039_v9 = vld [vmem:[#allocation5 + $0x18] sm:$0xff]   ;;  %v1040_v10 = vld [vmem:[#allocation5 + $0x50] sm:$0xff]   ;;  %s1124_s10 = scalar_lea.vmem %s1421_s21, 1024  ;;  %s1216_s25 = smov [#allocation7]  }
  0x42   : > { %v1048_v11 = vld [vmem:[%s1358_s30 + $0x4] ss:$8 sps:$4 sm:$0xff]   ;;  %v1041_v13 = vld [vmem:[#allocation5 + $0x10] sm:$0xff]   ;;  %v1046_v18 = vld [vmem:[%s1358_s30] ss:$8 sps:$4 sm:$0xff]   ;;  %p1125_p1 = scmp.ne.s32.totalorder %s1421_s21, %s1124_s10  ;;  %s1128_s8 = sshll.u32 %s1216_s25, 4  ;;  %s1129_s8 = int_to_ptr.vmem [resolvable:$false] %s1128_s8 }
  0x43   : > { %v1051_v12 = vld [vmem:[%s1358_s30 + $0x44] ss:$8 sps:$4 sm:$0xff]   ;;  %488 = vmatprep.mubr.bf16.mxu0 %v1048_v11  ;;  %v1049_v19 = vld [vmem:[%s1358_s30 + $0x40] ss:$8 sps:$4 sm:$0xff]   ;;  %v1052_v20 = vld [vmem:[%s1358_s30 + $0x14] ss:$8 sps:$4 sm:$0xff]   ;;  %p1131_p0 = scmp.lt.s32.totalorder %s1421_s21, %s1129_s8 }
  0x44   : > { %874 = vmatpush3.bf16.msra.mxu0 %v1033_v3  ;;  %944 = vmatpush3.bf16.msra.mxu1 %v1033_v3  ;;  %v1042_v14 = vld [vmem:[#allocation5 + $0x48] sm:$0xff]   ;;  %v1044_v16 = vld [vmem:[#allocation5 + $0x40] sm:$0xff]   ;;  %v1054_v21 = vld [vmem:[%s1358_s30 + $0x54] ss:$8 sps:$4 sm:$0xff]   ;;  %p1126_p8 = pnand %p1125_p1, %p1326_p13  ;;  %s1130_s18 = scalar_lea.vmem %s1129_s8, 2048 }
  0x45   : > { %875 = vmatprep.subr.bf16.mxu0 %v1034_v4  ;;  %937 = vmatprep.subr.bf16.mxu1 %v1034_v4  ;;  %v1043_v15 = vld [vmem:[#allocation5 + $0x8] sm:$0xff]   ;;  %v1045_v17 = vld [vmem:[#allocation5] sm:$0xff]   ;;  %v1056_v22 = vld [vmem:[%s1358_s30 + $0x10] ss:$8 sps:$4 sm:$0xff]   ;;  %p1132_p2 = scmp.lt.s32.totalorder %s1130_s18, %s1124_s10 }
  0x46   : > { %520 = vmatprep.mubr.bf16.mxu1 %v1051_v12  ;;  %v1057_v23 = vld [vmem:[%s1358_s30 + $0x50] ss:$8 sps:$4 sm:$0xff]   ;;  %v1058_v24 = vld [vmem:[%s1358_s30 + $0x24] ss:$8 sps:$4 sm:$0xff]   ;;  %v1062_v26 = vld [vmem:[%s1358_s30 + $0x20] ss:$8 sps:$4 sm:$0xff]   ;;  %p1127_p10 = pneg %p1126_p8 }
  0x47   : > { %v1060_v25 = vld [vmem:[%s1358_s30 + $0x64] ss:$8 sps:$4 sm:$0xff]   ;;  %v1063_v27 = vld [vmem:[%s1358_s30 + $0x60] ss:$8 sps:$4 sm:$0xff]   ;;  %v1064_v28 = vld [vmem:[%s1358_s30 + $0x34] ss:$8 sps:$4 sm:$0xff]   ;;  %p1133_p3 = por %p1132_p2, %p1131_p0 }
  0x48   : > { %876 = vmatpush3.bf16.msra.mxu0 %v1035_v5  ;;  %945 = vmatpush3.bf16.msra.mxu1 %v1035_v5  ;;  %v1066_v29 = vld [vmem:[%s1358_s30 + $0x74] ss:$8 sps:$4 sm:$0xff]   ;;  %v1068_v30 = vld [vmem:[%s1358_s30 + $0x30] ss:$8 sps:$4 sm:$0xff]   ;;  %v1387_v40 = vld [vmem:[%s1473_s2] ss:$0 sm:$0xff] }
  0x49   : > { %877 = vmatprep.subr.bf16.mxu0 %v1036_v6  ;;  %938 = vmatprep.subr.bf16.mxu1 %v1036_v6  ;;  %v1069_v31 = vld [vmem:[%s1358_s30 + $0x70] ss:$8 sps:$4 sm:$0xff]   ;;  %p1134_p5 = pnand %p1133_p3, %p1127_p10 }
  0x4c   : > { %878 = vmatpush3.bf16.msra.mxu0 %v1037_v7  ;;  %946 = vmatpush3.bf16.msra.mxu1 %v1037_v7 }
  0x4d   : > { %879 = vmatprep.subr.bf16.mxu0 %v1038_v8  ;;  %939 = vmatprep.subr.bf16.mxu1 %v1038_v8 }
  0x50   : > { %880 = vmatpush3.bf16.msra.mxu0 %v1039_v9  ;;  %947 = vmatpush3.bf16.msra.mxu1 %v1039_v9 }
  0x51   : > { %881 = vmatprep.subr.bf16.mxu0 %v1040_v10  ;;  %940 = vmatprep.subr.bf16.mxu1 %v1040_v10 }
  0x54   : > { %882 = vmatpush3.bf16.msra.mxu0 %v1041_v13  ;;  %948 = vmatpush3.bf16.msra.mxu1 %v1041_v13 }
  0x55   : > { %883 = vmatprep.subr.bf16.mxu0 %v1042_v14  ;;  %941 = vmatprep.subr.bf16.mxu1 %v1042_v14 }
  0x58   : > { %884 = vmatpush3.bf16.msra.mxu0 %v1043_v15  ;;  %949 = vmatpush3.bf16.msra.mxu1 %v1043_v15 }
  0x59   : > { %885 = vmatprep.subr.bf16.mxu0 %v1044_v16  ;;  %942 = vmatprep.subr.bf16.mxu1 %v1044_v16 }
  0x5c   : > { %886 = vmatpush3.bf16.msra.mxu0 %v1045_v17  ;;  %950 = vmatpush3.bf16.msra.mxu1 %v1045_v17 }
  0x5f   : > { %489 = vmatmul.mubr.bf16.vlgmr.msra.gmra.mxu0 %v1046_v18  ;;  %521 = vmatmul.mubr.bf16.vlgmr.msra.gmra.mxu1 %v1049_v19 }
  0x60   : > { %496 = vmatprep.mubr.bf16.mxu0 %v1052_v20  ;;  %528 = vmatprep.mubr.bf16.mxu1 %v1054_v21 }
  0x67   : > { %497 = vmatmul.mubr.bf16.gmra.mxu0 %v1056_v22  ;;  %529 = vmatmul.mubr.bf16.gmra.mxu1 %v1057_v23 }
  0x68   : > { %504 = vmatprep.mubr.bf16.mxu0 %v1058_v24  ;;  %536 = vmatprep.mubr.bf16.mxu1 %v1060_v25 }
  0x6f   : > { %505 = vmatmul.mubr.bf16.gmra.mxu0 %v1062_v26  ;;  %537 = vmatmul.mubr.bf16.gmra.mxu1 %v1063_v27 }
  0x70   : > { %512 = vmatprep.mubr.bf16.mxu0 %v1064_v28  ;;  %544 = vmatprep.mubr.bf16.mxu1 %v1066_v29 }
  0x77   : > { %513 = vmatmul.mubr.bf16.gmra.mxu0 %v1068_v30  ;;  %545 = vmatmul.mubr.bf16.gmra.mxu1 %v1069_v31 }
 0x11f   : > { %v887_v32 = vpop.f32.mrf.mxu0  ;;  %v911_v33 = vpop.f32.mrf.mxu1 }
 0x121   : > { %v888_v34 = vpop.f32.mrf.mxu0  ;;  %v912_v35 = vpop.f32.mrf.mxu1 }
 0x122   : > { %v889_v38 = vadd.f32 %v888_v34, %v887_v32  ;;  %v913_v39 = vadd.f32 %v912_v35, %v911_v33 }
 0x123   : > { %v890_v36 = vpop.f32.mrf.mxu0  ;;  %v914_v37 = vpop.f32.mrf.mxu1 }
 0x124   : > { %v491_v47 = vadd.f32 %v889_v38, %v1387_v40  ;;  %v523_v48 = vadd.f32 %v913_v39, %v1387_v40 }
 0x125   : > { %v891_v41 = vpop.f32.mrf.mxu0  ;;  %v915_v42 = vpop.f32.mrf.mxu1 }
 0x126   : > { %v892_v43 = vadd.f32 %v891_v41, %v890_v36  ;;  %v916_v44 = vadd.f32 %v915_v42, %v914_v37 }
 0x127   : > { %v893_v45 = vpop.f32.mrf.mxu0  ;;  %v917_v46 = vpop.f32.mrf.mxu1 }
 0x128   : > { %v494_v49 = vadd.f32 %v892_v43, %v1387_v40  ;;  %v526_v50 = vadd.f32 %v916_v44, %v1387_v40 }
 0x129   : > { %v894_v51 = vpop.f32.mrf.mxu0  ;;  %v918_v52 = vpop.f32.mrf.mxu1 }
 0x12a   : > { %v827_v53 = vpack.c.bf16 %v494_v49, %v491_v47  ;;  %v847_v54 = vpack.c.bf16 %v526_v50, %v523_v48  ;;  %v895_v57 = vadd.f32 %v894_v51, %v893_v45  ;;  %v919_v58 = vadd.f32 %v918_v52, %v917_v46 }
 0x12b   : > { %v896_v55 = vpop.f32.mrf.mxu0  ;;  %v920_v56 = vpop.f32.mrf.mxu1 }
 0x12c   : > { %828 = vst [vmem:[%s1394_s29] sm:$0xff] %v827_v53   ;;  %867 = vst [vmem:[%s1394_s29 + $0x20] sm:$0xff] %v847_v54   ;;  %v499_v1 = vadd.f32 %v895_v57, %v1387_v40  ;;  %v531_v2 = vadd.f32 %v919_v58, %v1387_v40 }
 0x12d   : > { %v897_v59 = vpop.f32.mrf.mxu0  ;;  %v921_v60 = vpop.f32.mrf.mxu1 }
 0x12e   : > { %v898_v61 = vadd.f32 %v897_v59, %v896_v55  ;;  %v922_v62 = vadd.f32 %v921_v60, %v920_v56 }
 0x12f   : > { %v899_v63 = vpop.f32.mrf.mxu0  ;;  %v923_v0 = vpop.f32.mrf.mxu1 }
 0x130   : > { %v502_v3 = vadd.f32 %v898_v61, %v1387_v40  ;;  %v534_v4 = vadd.f32 %v922_v62, %v1387_v40 }
 0x131   : > { %v900_v5 = vpop.f32.mrf.mxu0  ;;  %v924_v6 = vpop.f32.mrf.mxu1 }
 0x132   : > { %v832_v7 = vpack.c.bf16 %v502_v3, %v499_v1  ;;  %v852_v8 = vpack.c.bf16 %v534_v4, %v531_v2  ;;  %v901_v11 = vadd.f32 %v900_v5, %v899_v63  ;;  %v925_v12 = vadd.f32 %v924_v6, %v923_v0 }
 0x133   : > { %v902_v9 = vpop.f32.mrf.mxu0  ;;  %v926_v10 = vpop.f32.mrf.mxu1 }
 0x134   : > { %864 = vst [vmem:[%s1394_s29 + $0x8] sm:$0xff] %v832_v7   ;;  %868 = vst [vmem:[%s1394_s29 + $0x28] sm:$0xff] %v852_v8   ;;  %v507_v19 = vadd.f32 %v901_v11, %v1387_v40  ;;  %v539_v20 = vadd.f32 %v925_v12, %v1387_v40 }
 0x135   : > { %v903_v13 = vpop.f32.mrf.mxu0  ;;  %v927_v14 = vpop.f32.mrf.mxu1 }
 0x136   : > { %v904_v15 = vadd.f32 %v903_v13, %v902_v9  ;;  %v928_v16 = vadd.f32 %v927_v14, %v926_v10 }
 0x137   : > { %v905_v17 = vpop.f32.mrf.mxu0  ;;  %v929_v18 = vpop.f32.mrf.mxu1 }
 0x138   : > { %v510_v21 = vadd.f32 %v904_v15, %v1387_v40  ;;  %v542_v22 = vadd.f32 %v928_v16, %v1387_v40 }
 0x139   : > { %v906_v23 = vpop.f32.mrf.mxu0  ;;  %v930_v24 = vpop.f32.mrf.mxu1 }
 0x13a   : > { %v837_v25 = vpack.c.bf16 %v510_v21, %v507_v19  ;;  %v857_v26 = vpack.c.bf16 %v542_v22, %v539_v20  ;;  %v907_v29 = vadd.f32 %v906_v23, %v905_v17  ;;  %v931_v30 = vadd.f32 %v930_v24, %v929_v18 }
 0x13b   : > { %v908_v27 = vpop.f32.mrf.mxu0  ;;  %v932_v28 = vpop.f32.mrf.mxu1 }
 0x13c   : > { %865 = vst [vmem:[%s1394_s29 + $0x10] sm:$0xff] %v837_v25   ;;  %869 = vst [vmem:[%s1394_s29 + $0x30] sm:$0xff] %v857_v26   ;;  %v515_v35 = vadd.f32 %v907_v29, %v1387_v40  ;;  %v547_v36 = vadd.f32 %v931_v30, %v1387_v40 }
 0x13d   : > { %v909_v31 = vpop.f32.mrf.mxu0  ;;  %v933_v32 = vpop.f32.mrf.mxu1 }
 0x13e   : > { %v910_v33 = vadd.f32 %v909_v31, %v908_v27  ;;  %v934_v34 = vadd.f32 %v933_v32, %v932_v28 }
 0x140   : > { %v518_v37 = vadd.f32 %v910_v33, %v1387_v40  ;;  %v550_v38 = vadd.f32 %v934_v34, %v1387_v40 }
 0x142   : > { %v842_v39 = vpack.c.bf16 %v518_v37, %v515_v35  ;;  %v862_v41 = vpack.c.bf16 %v550_v38, %v547_v36 }
 0x144   : > { %866 = vst [vmem:[%s1394_s29 + $0x18] sm:$0xff] %v842_v39   ;;  %870 = vst [vmem:[%s1394_s29 + $0x38] sm:$0xff] %v862_v41  }
 0x145   : > { %1137 = shalt.err (!%p1134_p5)
}
 0x146   : > { %s1138_s26 = scalar_lea.hbm %s1419_s7, 1024  ;;  %s1142_s20 = scalar_lea.hbm %s1474_s3, 2048 }
 0x147   : > { %p1139_p7 = scmp.ne.s32.totalorder %s1419_s7, %s1138_s26  ;;  %p1143_p9 = scmp.lt.s32.totalorder %s1419_s7, %s1474_s3 }
 0x148   : > { %p1144_p11 = scmp.lt.s32.totalorder %s1142_s20, %s1138_s26 }
 0x149   : > { %p1140_p6 = pnand %p1139_p7, %p1326_p13 }
 0x14a   : > { %p1145_p12 = por %p1144_p11, %p1143_p9 }
 0x14b   : > { %p1141_p4 = pneg %p1140_p6 }
 0x14d   : > { %p1146_p1 = pnand %p1145_p12, %p1141_p4 }
 0x14f   : > { %1149 = shalt.err (!%p1146_p1)
}
 0x150   : > { %s1217_s29 = smov 64   ;;  %s1218_s4 = smov 4  }
 0x151   : > { %957 = dma.vmem_to_hbm [thread:$0]  (%p1326_p13), %s1421_s21, 1024, %s1419_s7, %s634_s15, %s1217_s29, %s1217_s29, %s1218_s4  }
 0x152 PF: > { %s662_s5 = sand.u32 1, %s1188_s12   ;;  %p1486_p8 = scmp.ne.s32.totalorder %s1479_s23, 0 }
 0x153   : > { %p1487_p10 = scmp.ge.s32.totalorder %s1208_s17, 2  ;;  %s663_s6 = scalar_lea.sflag [#allocation4], %s662_s5 }
 0x155   : > { %p968_p0 = pnand %p1487_p10, %p1486_p8 }
 0x157   : > { %p969_p2 = pneg %p968_p0 }
 0x159   : > { %1183 = dma.done.wait (%p969_p2), %s663_s6, 1024  }
 0x15a   : > { %1185 = vsyncadd (%p969_p2), %s663_s6, 4294966272  ;;  %s20_s17 = sadd.s32 1, %s1208_s17   ;;  %s1488_s12 = smov %s1192_s13 }
 0x15b   : > { %p17_p3 = scmp.ge.s32.totalorder %s20_s17, 4   ;;  %s1489_s13 = smov %s1196_s14 }
 0x15c   : > { %s1490_s14 = smov %s1335_s19  ;;  %s1491_s15 = smov %s1204_s16 }
 0x15d   : > { %s1492_s16 = smov %s1494_s28  ;;  %19 = sbr.rel (!%p17_p3) target bundleno = 7 (0x7), region = 81 }
 0x162   :  { %668 = vsyncpa [#allocation3], 1 }
 0x163   :  { %670 = vsyncpa [#allocation3 + $0x1], 1 }
 0x164   :  { %671 = vsyncpa [#allocation6], 1 }
 0x165   :  { %672 = vsyncpa [#allocation4], 1 }
 0x166   :  { %674 = vsyncpa [#allocation4 + $0x1], 1 }

</bundles_post_ra>
